<compile_context>
chip_gen: v7x
topology: tpu7x:2x2x1
jax: 0.10.0
libtpu: 0.0.40
codegen_flags: <defaults>
</compile_context>

<pallas_src>
import functools

import jax
import jax.numpy as jnp
from jax import lax
from jax.experimental import pallas as pl
from jax.experimental.pallas import tpu as pltpu


def _cdiv(a, b):
    return -(-a // b)


def _round_up(a, b):
    return _cdiv(a, b) * b


def _gem_sum_body(p_val, x_ref, o_ref, *, eps, hw, tile_hw, hw_tiles, rc, cl,
                  mask_oob):
    """Accumulate sum_{spatial} clamp(x, eps)**p per row into o_ref (f32)."""
    j = pl.program_id(1)
    accumulate = hw_tiles > 1          # HW split across the grid -> accumulate

    if accumulate:
        @pl.when(j == 0)
        def _init():
            o_ref[...] = jnp.zeros_like(o_ref)

    tile_nc = x_ref.shape[0]
    n_rc = tile_nc // rc               # row chunks per block (static)
    n_cl = tile_hw // cl               # full lane chunks per block (static)
    rem = tile_hw - n_cl * cl          # remainder lane chunk width (static)

    def lane_chunk(r0, c0, w, partial):
        xc = x_ref[pl.ds(r0, rc), pl.ds(c0, w)].astype(jnp.float32)
        xc = jnp.maximum(xc, eps)                      # clamp(min=eps)
        xp = xc ** p_val                               # x**p
        if mask_oob:
            # Zero out lanes that are padding of the spatial axis.
            lane = j * tile_hw + c0 + lax.broadcasted_iota(jnp.int32, (rc, w), 1)
            xp = jnp.where(lane < hw, xp, 0.0)
        return partial + jnp.sum(xp, axis=-1, keepdims=True)

    def row_chunk(r, carry):
        r0 = r * rc
        if not isinstance(r0, int):
            r0 = pl.multiple_of(r0, rc)
        partial = jnp.zeros((rc, 1), jnp.float32)
        if n_cl <= 8:
            for k in range(n_cl):                      # static, fully unrolled
                partial = lane_chunk(r0, k * cl, cl, partial)
        else:
            def lane_body(k, part):
                c0 = pl.multiple_of(k * cl, cl)
                return lane_chunk(r0, c0, cl, part)
            partial = lax.fori_loop(0, n_cl, lane_body, partial)
        if rem:
            partial = lane_chunk(r0, n_cl * cl, rem, partial)
        if accumulate:
            o_ref[pl.ds(r0, rc), :] = o_ref[pl.ds(r0, rc), :] + partial
        else:
            o_ref[pl.ds(r0, rc), :] = partial
        return carry

    if n_rc <= 8:
        for r in range(n_rc):                          # static, fully unrolled
            row_chunk(r, 0)
    else:
        lax.fori_loop(0, n_rc, row_chunk, 0)


def _gem_sum_kernel_static(x_ref, o_ref, *, p, eps, hw, tile_hw, hw_tiles, rc,
                           cl, mask_oob):
    # Fast path: p is a compile-time constant. Integer p lowers x**p to plain
    # VPU multiplies (no per-element transcendentals).
    p_val = int(p) if float(p) == float(int(p)) else float(p)
    _gem_sum_body(p_val, x_ref, o_ref, eps=eps, hw=hw, tile_hw=tile_hw,
                  hw_tiles=hw_tiles, rc=rc, cl=cl, mask_oob=mask_oob)


def _gem_sum_kernel_traced(p_ref, x_ref, o_ref, *, eps, hw, tile_hw, hw_tiles,
                           rc, cl, mask_oob):
    # p is a learnable parameter living in SMEM; x**p lowers to exp(p*log(x)).
    # TODO(synk): for bf16 inputs on v6e/v7x, doing the pow in bf16 on the EUP
    # (accumulating in f32) would roughly double transcendental throughput.
    _gem_sum_body(p_ref[0], x_ref, o_ref, eps=eps, hw=hw, tile_hw=tile_hw,
                  hw_tiles=hw_tiles, rc=rc, cl=cl, mask_oob=mask_oob)


def gem_pallas(x, p, eps=1e-6):
    """GeM pooling.

    x: (N, C, H, W)
    p: Python scalar (static fast path) or shape-(1,) float array (traced path,
       matching the PyTorch Parameter).
    Returns (N, C, 1, 1) in x.dtype.
    """
    N, C, H, W = x.shape
    NC, HW = N * C, H * W
    itemsize = x.dtype.itemsize
    x2d = x.reshape(NC, HW)

    # ---- Tiling: byte-driven, VMEM-budgeted with *physical* padded widths ----
    sublane = 8 if itemsize >= 4 else 16
    lane_pad_hw = _round_up(HW, 128)
    in_row_phys = lane_pad_hw * max(itemsize, 4)   # conservative (f32 headroom)
    out_row_phys = 128 * 4                         # (rows,1) f32 pads to 128 lanes
    target_block = 16 * 1024 * 1024                # combined in+out bytes / step
    vmem_limit = 48 * 1024 * 1024                  # > scoped defaults, < v7x 64MiB

    if in_row_phys * sublane <= target_block:
        # Common case: full spatial extent per block; tile only the row axis.
        tile_hw, hw_tiles, hw_pad = HW, 1, HW
        rows_by_bytes = max(
            sublane,
            (target_block // (in_row_phys + out_row_phys)) // sublane * sublane)
        # Keep >= ~8 grid steps when possible (v7x has 2 TensorCores).
        rows_by_par = max(sublane, _round_up(_cdiv(NC, 8), sublane))
        rows_all = _round_up(NC, sublane)
        tile_nc = min(rows_by_bytes, rows_by_par, rows_all)
    else:
        # Huge spatial maps: add an "arbitrary" reduction grid axis over H*W.
        tile_nc = min(_round_up(NC, sublane), 4 * sublane)
        max_tile_hw = max(
            128, (target_block // (tile_nc * max(itemsize, 4))) // 128 * 128)
        hw_tiles = _cdiv(HW, max_tile_hw)
        tile_hw = _round_up(_cdiv(HW, hw_tiles), 128)
        hw_pad = tile_hw * hw_tiles

    # Row/lane chunk sizes for the in-kernel reduction: keep each per-stage
    # intermediate around <=64 KiB so clamp/pow/sum stay vreg-resident.
    cl = min(tile_hw, 512)
    cl_pad = _round_up(cl, 128)
    rc = max(sublane,
             min(tile_nc, (64 * 1024 // (cl_pad * 4)) // sublane * sublane))
    tile_nc = max(rc, (tile_nc // rc) * rc)        # tile_nc multiple of rc

    nc_pad = _cdiv(NC, tile_nc) * tile_nc
    mask_oob = hw_pad != HW
    if nc_pad != NC or hw_pad != HW:
        # Padded rows produce harmless values (sliced off); padded lanes are
        # masked to zero inside the kernel.
        x2d = jnp.pad(x2d, ((0, nc_pad - NC), (0, hw_pad - HW)))

    grid = (nc_pad // tile_nc, hw_tiles)           # reduction axis last

    p_is_static = isinstance(p, (int, float))
    static_int_p = p_is_static and float(p) == float(int(p))

    cost = pl.CostEstimate(
        flops=4 * NC * HW,
        transcendentals=0 if static_int_p else 2 * NC * HW,
        bytes_accessed=NC * HW * itemsize + NC * 4,
    )
    compiler_params = pltpu.CompilerParams(
        dimension_semantics=("parallel", "arbitrary"),
        vmem_limit_bytes=vmem_limit,
    )

    kw = dict(eps=float(eps), hw=HW, tile_hw=tile_hw, hw_tiles=hw_tiles,
              rc=rc, cl=cl, mask_oob=mask_oob)

    x_spec = pl.BlockSpec((tile_nc, tile_hw), lambda i, j: (i, j))
    o_spec = pl.BlockSpec((tile_nc, 1), lambda i, j: (i, 0))
    out_shape = jax.ShapeDtypeStruct((nc_pad, 1), jnp.float32)

    if p_is_static:
        kernel = functools.partial(_gem_sum_kernel_static, p=float(p), **kw)
        sums = pl.pallas_call(
            kernel,
            out_shape=out_shape,
            grid_spec=pl.GridSpec(grid=grid, in_specs=[x_spec],
                                  out_specs=o_spec),
            compiler_params=compiler_params,
            cost_estimate=cost,
        )(x2d)
        inv_p = 1.0 / float(p)
    else:
        p_arr = jnp.asarray(p, dtype=jnp.float32).reshape((1,))
        kernel = functools.partial(_gem_sum_kernel_traced, **kw)
        sums = pl.pallas_call(
            kernel,
            out_shape=out_shape,
            grid_spec=pl.GridSpec(
                grid=grid,
                in_specs=[pl.BlockSpec(memory_space=pltpu.SMEM),  # p scalar
                          x_spec],
                out_specs=o_spec),
            compiler_params=compiler_params,
            cost_estimate=cost,
        )(p_arr, x2d)
        inv_p = 1.0 / p_arr

    # Tiny O(N*C) epilogue in XLA: lane-dense there; inside the kernel it would
    # run on a (rows, 1) column at 1/128 lane occupancy.
    pooled = (sums[:NC, 0] * (1.0 / HW)) ** inv_p
    return pooled.astype(x.dtype).reshape(N, C, 1, 1)


if __name__ == "__main__":
    key = jax.random.PRNGKey(0)
    N, C, H, W = 2, 4, 16, 16
    x = jax.random.normal(key, (N, C, H, W), dtype=jnp.float32)

    eps = 1e-6

    # --- Traced-p path (matches the nn.Module: p is a Parameter = ones(1)*3)
    p_param = jnp.ones((1,), dtype=jnp.float32) * 3.0
    out_traced = jax.block_until_ready(gem_pallas(x, p_param, eps=eps))

    # --- Static-p fast path (p known at trace time)
    out_static = jax.block_until_ready(gem_pallas(x, 3.0, eps=eps))

    # Reference check in plain JAX (same semantics as the PyTorch module).
    pv = float(p_param[0])
    ref = jnp.mean(
        jnp.maximum(x, eps) ** pv, axis=(-2, -1), keepdims=True
    ) ** (1.0 / pv)

    assert out_traced.shape == (N, C, 1, 1)
    assert out_static.shape == (N, C, 1, 1)
    assert jnp.allclose(out_traced, ref, rtol=1e-5, atol=1e-5)
    assert jnp.allclose(out_static, ref, rtol=1e-4, atol=1e-5)

    print("KERNEL_OK")
</pallas_src>

<mosaic_0001>
module attributes {stable_mosaic.version = 11 : i64} {
  func.func @_gem_sum_kernel_traced(%arg0: i32, %arg1: i32, %arg2: memref<1xf32, #tpu.memory_space<smem>>, %arg3: memref<8x256xf32, #tpu.memory_space<vmem>>, %arg4: memref<8x1xf32, #tpu.memory_space<vmem>>) attributes {dimension_semantics = [#tpu.dimension_semantics<parallel>, #tpu.dimension_semantics<arbitrary>], iteration_bounds = array<i64: 1, 1>, scalar_prefetch = 0 : i64, scratch_operands = 0 : i64, tpu.core_type = #tpu.core_type<tc>, window_params = [{transform_indices = @transform_0, window_bounds = array<i64: 1>}, {transform_indices = @transform_1, window_bounds = array<i64: 8, 256>}, {transform_indices = @transform_2, window_bounds = array<i64: 8, 1>}]} {
    %c0 = arith.constant 0 : index
    %0 = memref.load %arg2[%c0] : memref<1xf32, #tpu.memory_space<smem>>
    %cst = arith.constant 0.000000e+00 : f32
    %1 = vector.broadcast %cst : f32 to vector<8x1xf32>
    %c0_0 = arith.constant 0 : index
    %c0_1 = arith.constant 0 : index
    %2 = vector.load %arg3[%c0_0, %c0_1] : memref<8x256xf32, #tpu.memory_space<vmem>>, vector<8x256xf32>
    %cst_2 = arith.constant 9.99999997E-7 : f32
    %3 = vector.broadcast %cst_2 : f32 to vector<8x256xf32>
    %4 = arith.maximumf %2, %3 : vector<8x256xf32>
    %5 = vector.broadcast %0 : f32 to vector<8x256xf32>
    %6 = math.powf %4, %5 : vector<8x256xf32>
    %cst_3 = arith.constant dense<0.000000e+00> : vector<8xf32>
    %7 = vector.multi_reduction <add>, %6, %cst_3 [1] : vector<8x256xf32> to vector<8xf32>
    %8 = vector.shape_cast %7 : vector<8xf32> to vector<8x1xf32>
    %9 = arith.addf %1, %8 : vector<8x1xf32>
    %c0_4 = arith.constant 0 : index
    %c0_5 = arith.constant 0 : index
    %10 = vector.load %arg4[%c0_4, %c0_5] : memref<8x1xf32, #tpu.memory_space<vmem>>, vector<8x1xf32>
    tpu.vector_store %arg4[%c0_4, %c0_5], %9 {strides = array<i32>} : memref<8x1xf32, #tpu.memory_space<vmem>>, vector<8x1xf32>,
    return
  }
  func.func @transform_0(%arg0: i32, %arg1: i32) -> i32 {
    %c0_i32 = arith.constant 0 : i32
    %c0_i32_0 = arith.constant 0 : i32
    return %c0_i32 : i32
  }
  func.func @transform_1(%arg0: i32, %arg1: i32) -> (i32, i32) {
    %c0_i32 = arith.constant 0 : i32
    return %arg0, %arg1 : i32, i32
  }
  func.func @transform_2(%arg0: i32, %arg1: i32) -> (i32, i32) {
    %c0_i32 = arith.constant 0 : i32
    %c0_i32_0 = arith.constant 0 : i32
    return %arg0, %c0_i32 : i32, i32
  }
}

</mosaic_0001>

<bundles_post_ra>
// kernel: tpu_custom_call.1
= control target key start
LH: loop header
LB: loop body
LE: loop exit
PB: predicated region body
PF: predicated region fallthrough
CT: control target
= control target key end

     0   :  { %8 = vsyncpa [#allocation4], 0  ;;  %s182_s9 = smov [#allocation3]   ;;  %s382_s0 = inlined_call_operand.<no memory space> [shape: f32[1], index: 0, kind: input, shape index: {}]   ;;  %s383_s1 = inlined_call_operand.hbm [shape: f32[8,256], index: 1, kind: input, shape index: {}]   ;;  %s384_s2 = inlined_call_operand.vmem [shape: f32[8,1], index: 2, kind: output, shape index: {}]  }
   0x1   :  { %s17_s10 = sshll.u32 %s182_s9, 4  ;;  %s158_s13 = scalar_lea.hbm %s383_s1, 256  ;;  %s18_s10 = int_to_ptr.vmem [resolvable:$true] %s17_s10 }
   0x2   :  { %p159_p0 = scmp.ne.s32.totalorder %s383_s1, %s158_s13  ;;  %p162_p1 = scmp.lt.u32.totalorder %s158_s13, %s383_s1 }
   0x4   :  { %p164_p2 = pnand %p162_p1, %p159_p0 }
   0x6   :  { %167 = shalt.err (!%p164_p2)
}
   0x7   :  { %s168_s18 = scalar_lea.vmem %s18_s10, 256  ;;  %p173_p4 = scmp.lt.s32.totalorder %s18_s10, %s18_s10 }
   0x8   :  { %p169_p3 = scmp.ne.s32.totalorder %s18_s10, %s168_s18  ;;  %p174_p5 = scmp.lt.s32.totalorder %s168_s18, %s168_s18 }
   0xa   :  { %p175_p6 = por %p174_p5, %p173_p4 }
   0xc   :  { %p176_p7 = pnand %p175_p6, %p169_p3 }
   0xe   :  { %179 = shalt.err (!%p176_p7)
}
   0xf   :  { %20 = dma.hbm_to_vmem [thread:$0]  %s383_s1, 256, %s18_s10, [#allocation4]  }
  0x10   :  { %180 = dma.done.wait [#allocation4], 256  }
  0x11   :  { %181 = vsyncadd [#allocation4], 4294967040  ;;  %v215_v0 = vstv %s382_s0  ;;  %v25_v2 = vld [vmem:[#allocation3] sm:$0xff]  ;;  %v26_v3 = vld [vmem:[#allocation3 + $0x8] sm:$0xff]  ;;  %v183_v20 = vmov 2139095040   ;;  %v184_v26 = vmov 0  }
  0x12   :  { %v218_v1 = vand.u32 2147483647, %v215_v0  ;;  %v220_v4 = vmax.f32 %v25_v2, 1e-06  ;;  %v222_v5 = vmax.f32 %v26_v3, 1e-06  ;;  %v52_v8 = vtrunc.f32 %v215_v0 }
  0x13   :  { %vm51_vm7 = vcmp.lt.f32.partialorder %v215_v0, 0 }
  0x14   :  { %v56_v6 = vtrunc.f32 %v218_v1  ;;  %v226_v7 = vand.u32 2147483647, %v220_v4  ;;  %v230_v9 = vand.u32 2147483647, %v222_v5  ;;  %vm385_vm0 = vcmp.eq.f32.partialorder %v218_v1, 2139095040 }
  0x15   :  { %vm53_vm1 = vcmp.ne.f32.partialorder %v215_v0, %v52_v8  ;;  %vm55_vm5 = vcmp.lt.f32.partialorder %v218_v1, 1266679808  ;;  %vm64_vm8 = vcmp.eq.f32.partialorder %v220_v4, 0  ;;  %vm116_vm11 = vcmp.eq.f32.partialorder %v222_v5, 0 }
  0x16   :  { %150 = vlog2.f32 %v226_v7  ;;  %v57_v10 = vcvt.f32.s32 %v56_v6  ;;  %vm238_vm2 = vmor %vm53_vm1, %vm385_vm0  ;;  %vm67_vm9 = vcmp.gt.f32.partialorder %v226_v7, 1065353216  ;;  %vm119_vm13 = vcmp.gt.f32.partialorder %v230_v9, 1065353216 }
  0x17   :  { %152 = vlog2.f32 %v230_v9  ;;  %vm60_vm4 = vmneg %vm238_vm2  ;;  %vm386_vm14 = vcmp.lt.f32.partialorder %v220_v4, 0  ;;  %v83_v21 = vsel %vm51_vm7, 0, %v183_v20  ;;  %vm66_vm0 = vcmp.lt.s32.totalorder %v220_v4, 0 }
  0x18   :  { %v58_v11 = vand.u32 1, %v57_v10  ;;  %vm259_vm12 = vmand %vm51_vm7, %vm64_vm8  ;;  %v84_v25 = vxor.u32 2147483648, %v83_v21  ;;  %v71_v27 = vsel %vm51_vm7, 2139095040, %v184_v26 }
  0x19   :  { %vm267_vm15 = vmxor %vm51_vm7, %vm67_vm9 }
  0x1a   :  { %vm59_vm3 = vcmp.eq.s32.totalorder %v58_v11, 1  ;;  %vm277_vm1 = vmand %vm51_vm7, %vm116_vm11 }
  0x1b   :  { %vm61_vm6 = vmand %vm59_vm3, %vm60_vm4 }
  0x1c   :  { %vm250_vm10 = vmand %vm55_vm5, %vm61_vm6  ;;  %vm387_vm5 = vcmp.lt.f32.partialorder %v222_v5, 0 }
  0x1d   :  { %vm283_vm3 = vmxor %vm51_vm7, %vm119_vm13  ;;  %vm49_vm13 = vcmp.eq.f32.partialorder %v215_v0, 0  ;;  %vm118_vm7 = vcmp.lt.s32.totalorder %v222_v5, 0  ;;  %v85_v33 = vsel %vm250_vm10, %v84_v25, %v83_v21 }
  0x1e   :  { %vm291_vm4 = vmand %vm386_vm14, %vm238_vm2  ;;  %vm89_vm14 = vcmp.ne.f32.partialorder %v215_v0, %v215_v0 }
  0x1f   :  { %vm78_vm6 = vmor %vm259_vm12, %vm267_vm15  ;;  %vm80_vm15 = vcmp.eq.f32.partialorder %v220_v4, 3212836864 }
  0x20   :  { %v151_v13 = vpop.eup %150  ;;  %vm130_vm9 = vmor %vm277_vm1, %vm283_vm3  ;;  %v79_v30 = vsel %vm78_vm6, 2139095040, %v184_v26  ;;  %vm88_vm1 = vcmp.ne.f32.partialorder %v220_v4, %v220_v4  ;;  %vm65_vm3 = vcmp.eq.f32.partialorder %v220_v4, 1065353216  ;;  %vm68_vm6 = vcmp.eq.f32.partialorder %v226_v7, 2139095040 }
  0x21   :  { %v153_v14 = vpop.eup %152  ;;  %v45_v15 = vmul.f32 %v151_v13, %v215_v0  ;;  %vm314_vm12 = vmand %vm387_vm5, %vm238_vm2  ;;  %v131_v34 = vsel %vm130_vm9, 2139095040, %v184_v26  ;;  %vm132_vm2 = vcmp.eq.f32.partialorder %v222_v5, 3212836864  ;;  %v81_v38 = vsel %vm80_vm15, 1065353216, %v79_v30 }
  0x22   :  { %v97_v16 = vmul.f32 %v153_v14, %v215_v0  ;;  %vm73_vm5 = vmand %vm66_vm0, %vm250_vm10  ;;  %vm140_vm9 = vcmp.ne.f32.partialorder %v222_v5, %v222_v5  ;;  %v133_v43 = vsel %vm132_vm2, 1065353216, %v131_v34  ;;  %vm407_vm15 = vcmp.lt.f32.partialorder %v222_v5, 0 }
  0x23   :  { %154 = vpow2.f32 %v45_v15  ;;  %vm351_vm0 = vmor %vm88_vm1, %vm89_vm14  ;;  %v138_v45 = vsel %vm407_vm15, %v85_v33, %v83_v21  ;;  %vm408_vm1 = vcmp.eq.f32.partialorder %v218_v1, 2139095040 }
  0x24   :  { %156 = vpow2.f32 %v97_v16  ;;  %vm409_vm2 = vmmov %vm408_vm1 }
  0x2d   :  { %v155_v29 = vpop.eup %154 }
  0x2e   :  { %v157_v31 = vpop.eup %156  ;;  %v70_v32 = vsel %vm291_vm4, 2143289344, %v155_v29  ;;  %vm125_vm4 = vmand %vm118_vm7, %vm250_vm10 }
  0x2f   :  { %v72_v35 = vsel %vm64_vm8, %v71_v27, %v70_v32  ;;  %v122_v36 = vsel %vm314_vm12, 2143289344, %v157_v31  ;;  %vm404_vm8 = vcmp.lt.f32.partialorder %v220_v4, 0  ;;  %vm92_vm10 = vmor %vm65_vm3, %vm49_vm13  ;;  %vm120_vm12 = vcmp.eq.f32.partialorder %v230_v9, 2139095040 }
  0x30   :  { %v74_v37 = vxor.u32 2147483648, %v72_v35  ;;  %v124_v39 = vsel %vm116_vm11, %v71_v27, %v122_v36  ;;  %v86_v40 = vsel %vm404_vm8, %v85_v33, %v83_v21  ;;  %vm117_vm11 = vcmp.eq.f32.partialorder %v222_v5, 1065353216  ;;  %vm142_vm7 = vmor %vm140_vm9, %vm89_vm14 }
  0x31   :  { %v126_v42 = vxor.u32 2147483648, %v124_v39  ;;  %vm144_vm3 = vmor %vm117_vm11, %vm49_vm13  ;;  %vm36_vm14 = vcmask 7168  }
  0x32   :  { %v75_v44 = vsel %vm73_vm5, %v74_v37, %v72_v35  ;;  %vm50_vm5 = vcmp.eq.f32.partialorder %v215_v0, 1065353216 }
  0x33   :  { %v82_v46 = vsel %vm408_vm1, %v81_v38, %v75_v44  ;;  %v127_v47 = vsel %vm125_vm4, %v126_v42, %v124_v39 }
  0x34   :  { %v87_v48 = vsel %vm68_vm6, %v86_v40, %v82_v46  ;;  %v134_v49 = vsel %vm409_vm2, %v133_v43, %v127_v47 }
  0x35   :  { %v91_v50 = vsel %vm351_vm0, 2143289344, %v87_v48  ;;  %v139_v51 = vsel %vm120_vm12, %v138_v45, %v134_v49 }
  0x36   :  { %v93_v52 = vsel %vm92_vm10, 1065353216, %v91_v50  ;;  %v143_v53 = vsel %vm142_vm7, 2143289344, %v139_v51 }
  0x37   :  { %v94_v54 = vsel %vm50_vm5, %v220_v4, %v93_v52  ;;  %v145_v55 = vsel %vm144_vm3, 1065353216, %v143_v53 }
  0x38   :  { %v146_v56 = vsel %vm50_vm5, %v222_v5, %v145_v55 }
  0x39   :  { %v32_v57 = vadd.f32 %v146_v56, %v94_v54 }
  0x3b   :  { %33 = vadd.xlane.f32.xlu0 %v32_v57 }
  0xc8   :  { %v34_v58 = vpop.xlane.xlu0 %33 }
  0xc9   :  { %37 = vst.msk [vmem:[%s384_s2] sm:$0xff] %vm36_vm14, %v34_v58 }
  0xca   :  { %42 = vsyncpa [#allocation4], 1 }

</bundles_post_ra>
